<compile_context>
chip_gen: v6e
topology: v6e:2x2x1
jax: 0.10.0
libtpu: 0.0.40
codegen_flags: <defaults>
</compile_context>

<pallas_src>
import jax
import jax.numpy as jnp
from jax.experimental import pallas as pl
from jax.experimental.pallas import tpu as pltpu

STATE_DIM = 2
ACTION_DIM = 3
HIDDEN = 128
LANE = 128  # batch-tile granularity (batch sits on the lane axis)


def _round_up(x, m):
    return ((x + m - 1) // m) * m


def actor_kernel(x_ref, w1_ref, b1_ref, w2_ref, b2_ref, w3_ref, b3_ref, o_ref):
    x = x_ref[...]                       # [STATE_DIM, tb] f32 (batch on lanes)
    w1 = w1_ref[...]                     # [HIDDEN, STATE_DIM] f32

    # fc1: K=2 contraction -> two VPU FMAs instead of a padded MXU matmul.
    h1 = w1[:, 0:1] * x[0:1, :] + w1[:, 1:2] * x[1:2, :] + b1_ref[...]
    h1 = jnp.maximum(h1, 0.0)            # [HIDDEN, tb] f32

    # fc2: 128x128 MXU matmul; weights pre-cast once in prepare_params,
    # activations cast to match, accumulation stays f32.
    w2 = w2_ref[...]
    h2 = jnp.dot(w2, h1.astype(w2.dtype), preferred_element_type=jnp.float32)
    h2 = jnp.maximum(h2 + b2_ref[...], 0.0)        # [HIDDEN, tb] f32

    # fc3: [ACTION_DIM, HIDDEN] @ [HIDDEN, tb] -> [ACTION_DIM, tb];
    # the output block is lane-dense (tb lanes) and only 3 sublanes tall.
    w3 = w3_ref[...]
    logits = jnp.dot(w3, h2.astype(w3.dtype), preferred_element_type=jnp.float32)
    o_ref[...] = 5.0 * jnp.tanh(logits + b3_ref[...])


def prepare_params(params, matmul_dtype=jnp.float32):
    """One-time prep: transpose to [out, in], biases to columns, optional bf16.

    params: (w1 [2,128], b1 [1,128], w2 [128,128], b2 [1,128],
             w3 [128,3], b3 [1,3])  -- i.e. weights stored as [in, out].
    """
    w1, b1, w2, b2, w3, b3 = params
    w1t = jnp.asarray(w1.T, jnp.float32)        # [HIDDEN, STATE_DIM] (VPU path)
    w2t = jnp.asarray(w2.T, matmul_dtype)       # [HIDDEN, HIDDEN]
    w3t = jnp.asarray(w3.T, matmul_dtype)       # [ACTION_DIM, HIDDEN]
    b1c = jnp.asarray(b1.T, jnp.float32)        # [HIDDEN, 1]
    b2c = jnp.asarray(b2.T, jnp.float32)        # [HIDDEN, 1]
    b3c = jnp.asarray(b3.T, jnp.float32)        # [ACTION_DIM, 1]
    return (w1t, b1c, w2t, b2c, w3t, b3c)


def actor_forward(state, prepared, *, block_batch=2048):
    """state: [B, STATE_DIM] f32 -> action: [B, ACTION_DIM] f32."""
    w1t, b1c, w2t, b2c, w3t, b3c = prepared
    batch = state.shape[0]

    # Batch tile: lanes -> must be a multiple of 128 (defensive rounding).
    block_batch = max(LANE, (block_batch // LANE) * LANE)
    batch_pad = _round_up(batch, LANE)
    tb = min(block_batch, batch_pad)
    # v7x megacore: if one tile would cover a >=256-row batch, split into >=2
    # grid steps so both TensorCores get work (harmless on v5e/v6e).
    if tb == batch_pad and batch_pad >= 2 * LANE:
        tb = _round_up(batch_pad // 2, LANE)
    padded = _round_up(batch, tb)
    grid = (padded // tb,)

    # Transposed layout: batch on lanes. Padded columns are zeros; their
    # activations are nonzero but get sliced off below (never reduced over).
    state_t = jnp.transpose(state)                     # [STATE_DIM, batch]
    if padded != batch:
        state_t = jnp.pad(state_t, ((0, 0), (0, padded - batch)))

    # Weights / biases: constant index_map -> VMEM-resident, no re-DMA.
    def resident(arr):
        return pl.BlockSpec(arr.shape, lambda i: (0, 0))

    weight_bytes = sum(int(a.size) * a.dtype.itemsize for a in prepared)
    flops = 2 * padded * (STATE_DIM * HIDDEN + HIDDEN * HIDDEN + HIDDEN * ACTION_DIM)
    bytes_accessed = padded * (STATE_DIM + ACTION_DIM) * 4 + weight_bytes
    cost = pl.CostEstimate(flops=flops,
                           transcendentals=padded * ACTION_DIM,
                           bytes_accessed=bytes_accessed)

    # NOTE: no vmem_limit_bytes — actual footprint is a few MiB at tb=2048
    # (2x in/out tiles + ~33-130 KB weights + two [128, tb] f32 intermediates),
    # comfortably under the default scoped VMEM limits on v5e/v6e/v7x.
    out_t = pl.pallas_call(
        actor_kernel,
        out_shape=jax.ShapeDtypeStruct((ACTION_DIM, padded), jnp.float32),
        grid=grid,
        in_specs=[
            pl.BlockSpec((STATE_DIM, tb), lambda i: (0, i)),
            resident(w1t), resident(b1c),
            resident(w2t), resident(b2c),
            resident(w3t), resident(b3c),
        ],
        out_specs=pl.BlockSpec((ACTION_DIM, tb), lambda i: (0, i)),
        compiler_params=pltpu.CompilerParams(
            dimension_semantics=("parallel",)),
        cost_estimate=cost,
    )(state_t, w1t, b1c, w2t, b2c, w3t, b3c)

    return jnp.transpose(out_t[:, :batch])             # [batch, ACTION_DIM]


def init_params(key):
    """Deterministic init mimicking nn.Linear's default uniform(-1/sqrt(fan_in))."""
    def linear(key, fan_in, fan_out):
        kw, kb = jax.random.split(key)
        bound = 1.0 / jnp.sqrt(jnp.float32(fan_in))
        w = jax.random.uniform(kw, (fan_in, fan_out), jnp.float32, -bound, bound)
        b = jax.random.uniform(kb, (1, fan_out), jnp.float32, -bound, bound)
        return w, b

    k1, k2, k3 = jax.random.split(key, 3)
    w1, b1 = linear(k1, STATE_DIM, HIDDEN)
    w2, b2 = linear(k2, HIDDEN, HIDDEN)
    w3, b3 = linear(k3, HIDDEN, ACTION_DIM)
    return (w1, b1, w2, b2, w3, b3)


def actor_reference(state, params):
    w1, b1, w2, b2, w3, b3 = params
    with jax.default_matmul_precision("highest"):
        h1 = jnp.maximum(state @ w1 + b1, 0.0)
        h2 = jnp.maximum(h1 @ w2 + b2, 0.0)
        return 5.0 * jnp.tanh(h2 @ w3 + b3)


# TODO(synk): SMCenv dynamics and the DDPG training loop are host-side control
# code, not part of Actor.forward, and are intentionally not ported to Pallas.

if __name__ == "__main__":
    key = jax.random.PRNGKey(0)
    k_params, k_state = jax.random.split(key)
    params = init_params(k_params)

    # f32 matmul path, tiny DDPG-style inference batch: [4, 2] states.
    prep_f32 = prepare_params(params, matmul_dtype=jnp.float32)
    state = jax.random.normal(k_state, (4, STATE_DIM), jnp.float32)
    out = jax.block_until_ready(actor_forward(state, prep_f32))
    ref = actor_reference(state, params)
    assert out.shape == (4, ACTION_DIM)
    assert jnp.allclose(out, ref, atol=1e-4, rtol=1e-4)

    # Multi-tile grid (>=2 steps, exercises batch padding + v7x split rule)
    # with the f32 path at tight tolerance.
    state2 = jax.random.normal(jax.random.PRNGKey(1), (300, STATE_DIM), jnp.float32)
    ref2 = actor_reference(state2, params)
    out2 = jax.block_until_ready(actor_forward(state2, prep_f32, block_batch=256))
    assert out2.shape == (300, ACTION_DIM)
    assert jnp.allclose(out2, ref2, atol=1e-4, rtol=1e-4)

    # bf16-matmul path (f32 accumulation) at loosened tolerance.
    prep_bf16 = prepare_params(params, matmul_dtype=jnp.bfloat16)
    out3 = jax.block_until_ready(actor_forward(state2, prep_bf16))
    assert out3.shape == (300, ACTION_DIM)
    assert jnp.allclose(out3, ref2, atol=1e-1, rtol=1e-2)

    print("KERNEL_OK")
</pallas_src>

<mosaic_0001>
module attributes {stable_mosaic.version = 11 : i64} {
  func.func @actor_kernel(%arg0: i32, %arg1: memref<2x128xf32, #tpu.memory_space<vmem>>, %arg2: memref<128x2xf32, #tpu.memory_space<vmem>>, %arg3: memref<128x1xf32, #tpu.memory_space<vmem>>, %arg4: memref<128x128xf32, #tpu.memory_space<vmem>>, %arg5: memref<128x1xf32, #tpu.memory_space<vmem>>, %arg6: memref<3x128xf32, #tpu.memory_space<vmem>>, %arg7: memref<3x1xf32, #tpu.memory_space<vmem>>, %arg8: memref<3x128xf32, #tpu.memory_space<vmem>>) attributes {dimension_semantics = [#tpu.dimension_semantics<parallel>], iteration_bounds = array<i64: 1>, scalar_prefetch = 0 : i64, scratch_operands = 0 : i64, tpu.core_type = #tpu.core_type<tc>, window_params = [{transform_indices = @transform_0, window_bounds = array<i64: 2, 128>}, {pipeline_mode = #tpu.pipeline_mode<synchronous>, transform_indices = @transform_1, window_bounds = array<i64: 128, 2>}, {pipeline_mode = #tpu.pipeline_mode<synchronous>, transform_indices = @transform_2, window_bounds = array<i64: 128, 1>}, {pipeline_mode = #tpu.pipeline_mode<synchronous>, transform_indices = @transform_3, window_bounds = array<i64: 128, 128>}, {pipeline_mode = #tpu.pipeline_mode<synchronous>, transform_indices = @transform_4, window_bounds = array<i64: 128, 1>}, {pipeline_mode = #tpu.pipeline_mode<synchronous>, transform_indices = @transform_5, window_bounds = array<i64: 3, 128>}, {pipeline_mode = #tpu.pipeline_mode<synchronous>, transform_indices = @transform_6, window_bounds = array<i64: 3, 1>}, {transform_indices = @transform_7, window_bounds = array<i64: 3, 128>}]} {
    %c0 = arith.constant 0 : index
    %c0_0 = arith.constant 0 : index
    %0 = vector.load %arg1[%c0, %c0_0] : memref<2x128xf32, #tpu.memory_space<vmem>>, vector<2x128xf32>
    %c0_1 = arith.constant 0 : index
    %c0_2 = arith.constant 0 : index
    %1 = vector.load %arg2[%c0_1, %c0_2] : memref<128x2xf32, #tpu.memory_space<vmem>>, vector<128x2xf32>
    %2 = vector.extract_strided_slice %1 {offsets = [0, 0], sizes = [128, 1], strides = [1, 1]} : vector<128x2xf32> to vector<128x1xf32>
    %3 = vector.extract_strided_slice %0 {offsets = [0, 0], sizes = [1, 128], strides = [1, 1]} : vector<2x128xf32> to vector<1x128xf32>
    %4 = vector.broadcast %2 : vector<128x1xf32> to vector<128x128xf32>
    %5 = vector.broadcast %3 : vector<1x128xf32> to vector<128x128xf32>
    %6 = arith.mulf %4, %5 : vector<128x128xf32>
    %7 = vector.extract_strided_slice %1 {offsets = [0, 1], sizes = [128, 1], strides = [1, 1]} : vector<128x2xf32> to vector<128x1xf32>
    %8 = vector.extract_strided_slice %0 {offsets = [1, 0], sizes = [1, 128], strides = [1, 1]} : vector<2x128xf32> to vector<1x128xf32>
    %9 = vector.broadcast %7 : vector<128x1xf32> to vector<128x128xf32>
    %10 = vector.broadcast %8 : vector<1x128xf32> to vector<128x128xf32>
    %11 = arith.mulf %9, %10 : vector<128x128xf32>
    %12 = arith.addf %6, %11 : vector<128x128xf32>
    %c0_3 = arith.constant 0 : index
    %c0_4 = arith.constant 0 : index
    %13 = vector.load %arg3[%c0_3, %c0_4] : memref<128x1xf32, #tpu.memory_space<vmem>>, vector<128x1xf32>
    %14 = vector.broadcast %13 : vector<128x1xf32> to vector<128x128xf32>
    %15 = arith.addf %12, %14 : vector<128x128xf32>
    %cst = arith.constant 0.000000e+00 : f32
    %16 = vector.broadcast %cst : f32 to vector<128x128xf32>
    %17 = arith.maximumf %15, %16 : vector<128x128xf32>
    %c0_5 = arith.constant 0 : index
    %c0_6 = arith.constant 0 : index
    %18 = vector.load %arg4[%c0_5, %c0_6] : memref<128x128xf32, #tpu.memory_space<vmem>>, vector<128x128xf32>
    %cst_7 = arith.constant dense<0.000000e+00> : vector<128x128xf32>
    %19 = tpu.matmul %18, %17, %cst_7 {dimension_numbers = #tpu.dot_dimension_numbers<[1], [0], [0], [1], [0, 0, 1, 1], [], []>} : vector<128x128xf32>, vector<128x128xf32>, vector<128x128xf32> -> vector<128x128xf32>
    %c0_8 = arith.constant 0 : index
    %c0_9 = arith.constant 0 : index
    %20 = vector.load %arg5[%c0_8, %c0_9] : memref<128x1xf32, #tpu.memory_space<vmem>>, vector<128x1xf32>
    %21 = vector.broadcast %20 : vector<128x1xf32> to vector<128x128xf32>
    %22 = arith.addf %19, %21 : vector<128x128xf32>
    %cst_10 = arith.constant 0.000000e+00 : f32
    %23 = vector.broadcast %cst_10 : f32 to vector<128x128xf32>
    %24 = arith.maximumf %22, %23 : vector<128x128xf32>
    %c0_11 = arith.constant 0 : index
    %c0_12 = arith.constant 0 : index
    %25 = vector.load %arg6[%c0_11, %c0_12] : memref<3x128xf32, #tpu.memory_space<vmem>>, vector<3x128xf32>
    %cst_13 = arith.constant dense<0.000000e+00> : vector<3x128xf32>
    %26 = tpu.matmul %25, %24, %cst_13 {dimension_numbers = #tpu.dot_dimension_numbers<[1], [0], [0], [1], [0, 0, 1, 1], [], []>} : vector<3x128xf32>, vector<128x128xf32>, vector<3x128xf32> -> vector<3x128xf32>
    %c0_14 = arith.constant 0 : index
    %c0_15 = arith.constant 0 : index
    %27 = vector.load %arg7[%c0_14, %c0_15] : memref<3x1xf32, #tpu.memory_space<vmem>>, vector<3x1xf32>
    %28 = vector.broadcast %27 : vector<3x1xf32> to vector<3x128xf32>
    %29 = arith.addf %26, %28 : vector<3x128xf32>
    %30 = math.tanh %29 : vector<3x128xf32>
    %cst_16 = arith.constant 5.000000e+00 : f32
    %31 = vector.broadcast %cst_16 : f32 to vector<3x128xf32>
    %32 = arith.mulf %31, %30 : vector<3x128xf32>
    %c0_17 = arith.constant 0 : index
    %c0_18 = arith.constant 0 : index
    %33 = vector.load %arg8[%c0_17, %c0_18] : memref<3x128xf32, #tpu.memory_space<vmem>>, vector<3x128xf32>
    tpu.vector_store %arg8[%c0_17, %c0_18], %32 {strides = array<i32>} : memref<3x128xf32, #tpu.memory_space<vmem>>, vector<3x128xf32>,
    return
  }
  func.func @transform_0(%arg0: i32) -> (i32, i32) {
    %c0_i32 = arith.constant 0 : i32
    %c0_i32_0 = arith.constant 0 : i32
    return %c0_i32, %arg0 : i32, i32
  }
  func.func @transform_1(%arg0: i32) -> (i32, i32) {
    %c0_i32 = arith.constant 0 : i32
    %c0_i32_0 = arith.constant 0 : i32
    %c0_i32_1 = arith.constant 0 : i32
    return %c0_i32, %c0_i32_0 : i32, i32
  }
  func.func @transform_2(%arg0: i32) -> (i32, i32) {
    %c0_i32 = arith.constant 0 : i32
    %c0_i32_0 = arith.constant 0 : i32
    %c0_i32_1 = arith.constant 0 : i32
    return %c0_i32, %c0_i32_0 : i32, i32
  }
  func.func @transform_3(%arg0: i32) -> (i32, i32) {
    %c0_i32 = arith.constant 0 : i32
    %c0_i32_0 = arith.constant 0 : i32
    %c0_i32_1 = arith.constant 0 : i32
    return %c0_i32, %c0_i32_0 : i32, i32
  }
  func.func @transform_4(%arg0: i32) -> (i32, i32) {
    %c0_i32 = arith.constant 0 : i32
    %c0_i32_0 = arith.constant 0 : i32
    %c0_i32_1 = arith.constant 0 : i32
    return %c0_i32, %c0_i32_0 : i32, i32
  }
  func.func @transform_5(%arg0: i32) -> (i32, i32) {
    %c0_i32 = arith.constant 0 : i32
    %c0_i32_0 = arith.constant 0 : i32
    %c0_i32_1 = arith.constant 0 : i32
    return %c0_i32, %c0_i32_0 : i32, i32
  }
  func.func @transform_6(%arg0: i32) -> (i32, i32) {
    %c0_i32 = arith.constant 0 : i32
    %c0_i32_0 = arith.constant 0 : i32
    %c0_i32_1 = arith.constant 0 : i32
    return %c0_i32, %c0_i32_0 : i32, i32
  }
  func.func @transform_7(%arg0: i32) -> (i32, i32) {
    %c0_i32 = arith.constant 0 : i32
    %c0_i32_0 = arith.constant 0 : i32
    return %c0_i32, %arg0 : i32, i32
  }
}

</mosaic_0001>

<bundles_post_ra>
// kernel: tpu_custom_call.1
= control target key start
LH: loop header
LB: loop body
LE: loop exit
PB: predicated region body
PF: predicated region fallthrough
CT: control target
= control target key end

     0   :  { %v927_v2 = vmov 1   ;;  %v928_v3 = vmov 0   ;;  %s1286_s0 = inlined_call_operand.vmem [shape: f32[2,128], index: 0, kind: input, shape index: {}]   ;;  %s1287_s1 = inlined_call_operand.vmem [shape: f32[128,2], index: 1, kind: input, shape index: {}]   ;;  %s1288_s2 = inlined_call_operand.vmem [shape: f32[128,1], index: 2, kind: input, shape index: {}]   ;;  %s1289_s3 = inlined_call_operand.vmem [shape: f32[128,128], index: 3, kind: input, shape index: {}]   ;;  %s1290_s4 = inlined_call_operand.vmem [shape: f32[128,1], index: 4, kind: input, shape index: {}]   ;;  %s1291_s5 = inlined_call_operand.vmem [shape: f32[3,128], index: 5, kind: input, shape index: {}]   ;;  %s1292_s6 = inlined_call_operand.vmem [shape: f32[3,1], index: 6, kind: input, shape index: {}]   ;;  %s1293_s7 = inlined_call_operand.hbm [shape: f32[3,128], index: 7, kind: output, shape index: {}]  }
   0x1   :  { %v43_v0 = vld [vmem:[%s1287_s1 + $0x78] sm:$0xff]  ;;  %v42_v1 = vld [vmem:[%s1287_s1 + $0x70] sm:$0xff]  ;;  %884 = vset.pattern.permute.xlu0 %v927_v2  ;;  %885 = vset.pattern.permute.xlu1 %v928_v3  ;;  %v41_v4 = vld [vmem:[%s1287_s1 + $0x68] sm:$0xff] }
   0x2   :  { %205 = vperm.xlu0 %884, %v43_v0   ;;  %116 = vperm.xlu1 %885, %v42_v1   ;;  %v38_v5 = vld [vmem:[%s1287_s1 + $0x50] sm:$0xff]  ;;  %v37_v6 = vld [vmem:[%s1287_s1 + $0x48] sm:$0xff]  ;;  %v259_v7 = vld [vmem:[%s1288_s2 + $0x78] sm:$0xff] }
   0x3   :  { %v34_v8 = vld [vmem:[%s1287_s1 + $0x30] sm:$0xff] }
   0x6   :  { %886 = vset.pattern.permute.xlu1 %v927_v2  ;;  %197 = vperm.xlu0 %884, %v41_v4  }
   0x7   :  { %201 = vperm.xlu1 %886, %v42_v1  }
   0xa   :  { %185 = vperm.xlu0 %884, %v38_v5  }
   0xb   :  { %887 = vset.pattern.permute.xlu1 %v928_v3 }
   0xc   :  { %111 = vperm.xlu1 %887, %v41_v4  }
   0xe   :  { %181 = vperm.xlu0 %884, %v37_v6  }
   0xf   :  { %12 = vsyncpa [#allocation3], 0  ;;  %v40_v9 = vld [vmem:[%s1287_s1 + $0x60] sm:$0xff]  ;;  %v33_v10 = vld [vmem:[%s1287_s1 + $0x28] sm:$0xff]  ;;  %v124_v57 = vlaneseq  ;;  %vm930_vm0 = vmmov 0   ;;  %s931_s8 = smov [#allocation2]  }
  0x10   :  { %337 = vperm.xlu1 %887, %v259_v7   ;;  %v258_v11 = vld [vmem:[%s1288_s2 + $0x70] sm:$0xff]  ;;  %v1017_v13 = vld [vmem:[%s1287_s1 + $0x8] sm:$0xff]  ;;  %v39_v14 = vld [vmem:[%s1287_s1 + $0x58] sm:$0xff]  ;;  %s731_s9 = sshll.u32 %s931_s8, 4  ;;  %s732_s9 = int_to_ptr.vmem [resolvable:$true] %s731_s9 }
  0x11   :  { %v1010_v12 = vld [vmem:[%s1287_s1 + $0x10] sm:$0xff]  ;;  %v256_v15 = vld [vmem:[%s1288_s2 + $0x60] sm:$0xff]  ;;  %v257_v16 = vld [vmem:[%s1288_s2 + $0x68] sm:$0xff]  ;;  %v125_v61 = vshrl.u32 %v124_v57, 7  ;;  %s905_s10 = scalar_lea.vmem %s732_s9, 64  ;;  %p910_p1 = scmp.lt.s32.totalorder %s732_s9, %s732_s9 }
  0x12   :  { %169 = vperm.xlu0 %884, %v34_v8   ;;  %v255_v17 = vld [vmem:[%s1288_s2 + $0x58] sm:$0xff]  ;;  %v36_v18 = vld [vmem:[%s1287_s1 + $0x40] sm:$0xff]  ;;  %v254_v20 = vld [vmem:[%s1288_s2 + $0x50] sm:$0xff]  ;;  %p906_p0 = scmp.ne.s32.totalorder %s732_s9, %s905_s10  ;;  %p911_p2 = scmp.lt.s32.totalorder %s905_s10, %s905_s10 }
  0x13   :  { %v35_v19 = vld [vmem:[%s1287_s1 + $0x38] sm:$0xff]  ;;  %v253_v21 = vld [vmem:[%s1288_s2 + $0x48] sm:$0xff]  ;;  %v32_v22 = vld [vmem:[%s1287_s1 + $0x20] sm:$0xff]  ;;  %v210_v63 = vsub.s32 1, %v125_v61 }
  0x14   :  { %888 = vset.pattern.permute.xlu1 %v927_v2  ;;  %v31_v23 = vld [vmem:[%s1287_s1 + $0x18] sm:$0xff]  ;;  %v249_v24 = vld [vmem:[%s1288_s2 + $0x28] sm:$0xff]  ;;  %v252_v25 = vld [vmem:[%s1288_s2 + $0x40] sm:$0xff]  ;;  %p912_p3 = por %p911_p2, %p910_p1 }
  0x15   :  { %193 = vperm.xlu1 %888, %v40_v9   ;;  %v28_v26 = vld [vmem:[%s1287_s1] sm:$0xff]  ;;  %v245_v27 = vld [vmem:[%s1288_s2 + $0x8] sm:$0xff]  ;;  %v251_v28 = vld [vmem:[%s1288_s2 + $0x38] sm:$0xff] }
  0x16   :  { %165 = vperm.xlu0 %884, %v33_v10   ;;  %v403_v29 = vld [vmem:[%s1290_s4 + $0x78] sm:$0xff]  ;;  %v401_v30 = vld [vmem:[%s1290_s4 + $0x68] sm:$0xff]  ;;  %v250_v31 = vld [vmem:[%s1288_s2 + $0x30] sm:$0xff]  ;;  %p913_p4 = pnand %p912_p3, %p906_p0 }
  0x17   :  { %v399_v32 = vld [vmem:[%s1290_s4 + $0x58] sm:$0xff]  ;;  %v397_v33 = vld [vmem:[%s1290_s4 + $0x48] sm:$0xff]  ;;  %v248_v36 = vld [vmem:[%s1288_s2 + $0x20] sm:$0xff] }
  0x18   :  { %v395_v34 = vld [vmem:[%s1290_s4 + $0x38] sm:$0xff]  ;;  %v393_v35 = vld [vmem:[%s1290_s4 + $0x28] sm:$0xff]  ;;  %v646_v40 = vld [vmem:[%s1292_s6] sm:$0x7] }
  0x19   :  { %889 = vset.pattern.permute.xlu1 %v928_v3  ;;  %v391_v37 = vld [vmem:[%s1290_s4 + $0x18] sm:$0xff]  ;;  %v389_v38 = vld [vmem:[%s1290_s4 + $0x8] sm:$0xff]  ;;  %v246_v41 = vld [vmem:[%s1288_s2 + $0x10] sm:$0xff] }
  0x1a   :  { %332 = vperm.xlu1 %889, %v258_v11   ;;  %153 = vperm.xlu0 %884, %v1010_v12   ;;  %v247_v39 = vld [vmem:[%s1288_s2 + $0x18] sm:$0xff]  ;;  %v244_v42 = vld [vmem:[%s1288_s2] sm:$0xff]  ;;  %v402_v46 = vld [vmem:[%s1290_s4 + $0x70] sm:$0xff] }
  0x1b   :  { %v372_v45 = vld [vmem:[%s1289_s3] sm:$0xff]  ;;  %v398_v52 = vld [vmem:[%s1290_s4 + $0x50] sm:$0xff] }
  0x1c   :  { %820 = vmatprep.mubr.f32.mxu0 %v372_v45  ;;  %v400_v49 = vld [vmem:[%s1290_s4 + $0x60] sm:$0xff]  ;;  %v394_v58 = vld [vmem:[%s1290_s4 + $0x30] sm:$0xff] }
  0x1d   :  { %v396_v55 = vld [vmem:[%s1290_s4 + $0x40] sm:$0xff] }
  0x1e   :  { %890 = vset.pattern.permute.xlu1 %v927_v2  ;;  %149 = vperm.xlu0 %884, %v1017_v13   ;;  %v392_v62 = vld [vmem:[%s1290_s4 + $0x20] sm:$0xff] }
  0x1f   :  { %189 = vperm.xlu1 %890, %v39_v14   ;;  %v27_v4 = vld [vmem:[%s1286_s0] sm:$0x3] }
  0x22   :  { %900 = vset.pattern.permute.xlu0 %v928_v3 }
  0x23   :  { %891 = vset.pattern.permute.xlu1 %v928_v3  ;;  %121 = vperm.xlu0 %900, %v43_v0  }
  0x24   :  { %96 = vperm.xlu1 %891, %v38_v5   ;;  %v1159_v5 = vrot.slane %v27_v4, %v210_v63 }
  0x27   :  { %106 = vperm.xlu0 %900, %v40_v9   ;;  %v388_v9 = vld [vmem:[%s1290_s4] sm:$0xff] }
  0x28   :  { %322 = vperm.xlu1 %891, %v256_v15  }
  0x2b   :  { %101 = vperm.xlu0 %900, %v39_v14  }
  0x2c   :  { %91 = vperm.xlu1 %891, %v37_v6  }
  0x2f   :  { %327 = vperm.xlu0 %900, %v257_v16  }
  0x30   :  { %317 = vperm.xlu1 %891, %v255_v17  }
  0x33   :  { %86 = vperm.xlu0 %900, %v36_v18  }
  0x34   :  { %892 = vset.pattern.permute.xlu1 %v927_v2 }
  0x35   :  { %177 = vperm.xlu1 %892, %v36_v18  }
  0x37   :  { %81 = vperm.xlu0 %900, %v35_v19  }
  0x39   :  { %893 = vset.pattern.permute.xlu1 %v928_v3 }
  0x3a   :  { %312 = vperm.xlu1 %893, %v254_v20  }
  0x3b   :  { %307 = vperm.xlu0 %900, %v253_v21  }
  0x3e   :  { %894 = vset.pattern.permute.xlu1 %v927_v2 }
  0x3f   :  { %173 = vperm.xlu1 %894, %v35_v19   ;;  %66 = vperm.xlu0 %900, %v32_v22  }
  0x43   :  { %895 = vset.pattern.permute.xlu1 %v928_v3  ;;  %61 = vperm.xlu0 %900, %v31_v23  }
  0x44   :  { %76 = vperm.xlu1 %895, %v34_v8  }
  0x47   :  { %287 = vperm.xlu0 %900, %v249_v24  }
  0x48   :  { %302 = vperm.xlu1 %895, %v252_v25  }
  0x4b   :  { %46 = vperm.xlu0 %900, %v28_v26  }
  0x4c   :  { %71 = vperm.xlu1 %895, %v33_v10  }
  0x4f   :  { %267 = vperm.xlu0 %900, %v245_v27  }
  0x50   :  { %297 = vperm.xlu1 %895, %v251_v28  }
  0x53   :  { %481 = vperm.xlu0 %900, %v403_v29  }
  0x54   :  { %896 = vset.pattern.permute.xlu1 %v927_v2 }
  0x55   :  { %161 = vperm.xlu1 %896, %v32_v22  }
  0x57   :  { %471 = vperm.xlu0 %900, %v401_v30  }
  0x59   :  { %897 = vset.pattern.permute.xlu1 %v928_v3 }
  0x5a   :  { %292 = vperm.xlu1 %897, %v250_v31  }
  0x5b   :  { %461 = vperm.xlu0 %900, %v399_v32  }
  0x5e   :  { %898 = vset.pattern.permute.xlu1 %v927_v2 }
  0x5f   :  { %157 = vperm.xlu1 %898, %v31_v23   ;;  %451 = vperm.xlu0 %900, %v397_v33  }
  0x63   :  { %899 = vset.pattern.permute.xlu1 %v928_v3  ;;  %441 = vperm.xlu0 %900, %v395_v34  }
  0x64   :  { %56 = vperm.xlu1 %899, %v1010_v12  }
  0x67   :  { %431 = vperm.xlu0 %900, %v393_v35  }
  0x68   :  { %282 = vperm.xlu1 %899, %v248_v36  }
  0x6b   :  { %421 = vperm.xlu0 %900, %v391_v37  }
  0x6c   :  { %51 = vperm.xlu1 %899, %v1017_v13  }
  0x6f   :  { %411 = vperm.xlu0 %900, %v389_v38  }
  0x70   :  { %277 = vperm.xlu1 %899, %v247_v39  }
  0x73   :  { %649 = vperm.xlu0 %900, %v646_v40  }
  0x74   :  { %901 = vset.pattern.permute.xlu1 %v927_v2  ;;  %v126_v2 = vsub.s32 0, %v125_v61 }
  0x75   :  { %145 = vperm.xlu1 %901, %v28_v26  }
  0x76   :  { %v1163_v8 = vrot.slane %v27_v4, %v126_v2 }
  0x79   :  { %902 = vset.pattern.permute.xlu1 %v928_v3  ;;  %v390_v3 = vld [vmem:[%s1290_s4 + $0x10] sm:$0xff] }
  0x7a   :  { %272 = vperm.xlu1 %902, %v246_v41  }
  0x7d   :  { %v117_v43 = vpop.permute.xlu1 %116  ;;  %v206_v44 = vpop.permute.xlu0 %205 }
  0x7e   :  { %262 = vperm.xlu1 %902, %v244_v42   ;;  %v227_v10 = vmul.f32 %v1159_v5, %v206_v44  ;;  %v142_v13 = vmul.f32 %v1163_v8, %v117_v43 }
  0x81   :  { %v198_v47 = vpop.permute.xlu0 %197 }
  0x82   :  { %v202_v48 = vpop.permute.xlu1 %201  ;;  %476 = vperm.xlu1 %902, %v402_v46   ;;  %v225_v23 = vmul.f32 %v1159_v5, %v198_v47 }
  0x83   :  { %v226_v11 = vmul.f32 %v1159_v5, %v202_v48 }
  0x85   :  { %v1131_v50 = vpop.permute.xlu0 %185  ;;  %v242_v16 = vadd.f32 %v226_v11, %v142_v13 }
  0x86   :  { %466 = vperm.xlu1 %902, %v400_v49   ;;  %v222_v43 = vmul.f32 %v1159_v5, %v1131_v50 }
  0x87   :  { %v112_v51 = vpop.permute.xlu1 %111 }
  0x88   :  { %v141_v24 = vmul.f32 %v1163_v8, %v112_v51 }
  0x89   :  { %v1136_v53 = vpop.permute.xlu0 %181 }
  0x8a   :  { %456 = vperm.xlu1 %902, %v398_v52   ;;  %v241_v33 = vadd.f32 %v225_v23, %v141_v24  ;;  %v221_v46 = vmul.f32 %v1159_v5, %v1136_v53 }
  0x8b   :  { %v338_v54 = vpop.permute.xlu1 %337 }
  0x8d   :  { %v1141_v56 = vpop.permute.xlu0 %169 }
  0x8e   :  { %446 = vperm.xlu1 %902, %v396_v55  }
  0x90   :  { %v194_v59 = vpop.permute.xlu1 %193 }
  0x91   :  { %v1146_v60 = vpop.permute.xlu0 %165  ;;  %v224_v25 = vmul.f32 %v1159_v5, %v194_v59 }
  0x92   :  { %436 = vperm.xlu1 %902, %v394_v58  }
  0x95   :  { %v333_v0 = vpop.permute.xlu1 %332  ;;  %v1151_v1 = vpop.permute.xlu0 %153 }
  0x96   :  { %426 = vperm.xlu1 %902, %v392_v62   ;;  %v354_v19 = vadd.f32 %v333_v0, %v242_v16 }
  0x98   :  { %v370_v28 = vmax.f32 %v354_v19, 0.0 }
  0x99   :  { %v1161_v6 = vpop.permute.xlu0 %149 }
  0x9a   :  { %v190_v7 = vpop.permute.xlu1 %189  ;;  %416 = vperm.xlu1 %902, %v390_v3  }
  0x9b   :  { %v223_v29 = vmul.f32 %v1159_v5, %v190_v7 }
  0x9e   :  { %v122_v12 = vpop.permute.xlu0 %121  ;;  %406 = vperm.xlu1 %902, %v388_v9  }
  0x9f   :  { %v143_v14 = vmul.f32 %v1163_v8, %v122_v12  ;;  %v97_v15 = vpop.permute.xlu1 %96 }
  0xa0   :  { %v138_v44 = vmul.f32 %v1163_v8, %v97_v15 }
  0xa1   :  { %v243_v17 = vadd.f32 %v227_v10, %v143_v14 }
  0xa2   :  { %v107_v18 = vpop.permute.xlu0 %106  ;;  %v238_v51 = vadd.f32 %v222_v43, %v138_v44 }
  0xa3   :  { %v140_v20 = vmul.f32 %v1163_v8, %v107_v18  ;;  %v323_v21 = vpop.permute.xlu1 %322  ;;  %v355_v22 = vadd.f32 %v338_v54, %v243_v17  ;;  %v217_v18 = vmul.f32 %v1159_v5, %v1146_v60 }
  0xa5   :  { %v371_v26 = vmax.f32 %v355_v22, 0.0  ;;  %v240_v30 = vadd.f32 %v224_v25, %v140_v20 }
  0xa6   :  { %v102_v27 = vpop.permute.xlu0 %101 }
  0xa7   :  { %v139_v31 = vmul.f32 %v1163_v8, %v102_v27  ;;  %v92_v32 = vpop.permute.xlu1 %91  ;;  %788 = vmatprep.subr.mxu0 %v371_v26  ;;  %v352_v36 = vadd.f32 %v323_v21, %v240_v30  ;;  %v218_v21 = vmul.f32 %v1159_v5, %v1141_v56 }
  0xa8   :  { %789 = vmatpush3.msra.mxu0 %v371_v26  ;;  %v137_v47 = vmul.f32 %v1163_v8, %v92_v32 }
  0xa9   :  { %790 = vmatprep.subr.mxu0 %v370_v28  ;;  %v239_v34 = vadd.f32 %v223_v29, %v139_v31  ;;  %v368_v42 = vmax.f32 %v352_v36, 0.0 }
  0xaa   :  { %v328_v35 = vpop.permute.xlu0 %327  ;;  %791 = vmatpush3.msra.mxu0 %v370_v28  ;;  %v237_v54 = vadd.f32 %v221_v46, %v137_v47 }
  0xab   :  { %v353_v37 = vadd.f32 %v328_v35, %v241_v33  ;;  %v318_v38 = vpop.permute.xlu1 %317 }
  0xac   :  { %v351_v40 = vadd.f32 %v318_v38, %v239_v34 }
  0xad   :  { %v369_v39 = vmax.f32 %v353_v37, 0.0 }
  0xae   :  { %v87_v41 = vpop.permute.xlu0 %86  ;;  %v367_v48 = vmax.f32 %v351_v40, 0.0 }
  0xaf   :  { %792 = vmatprep.subr.mxu0 %v369_v39  ;;  %v136_v53 = vmul.f32 %v1163_v8, %v87_v41 }
  0xb0   :  { %v178_v45 = vpop.permute.xlu1 %177  ;;  %793 = vmatpush3.msra.mxu0 %v369_v39 }
  0xb1   :  { %794 = vmatprep.subr.mxu0 %v368_v42  ;;  %v220_v62 = vmul.f32 %v1159_v5, %v178_v45  ;;  %v213_v45 = vmul.f32 %v1159_v5, %v1161_v6 }
  0xb2   :  { %v82_v49 = vpop.permute.xlu0 %81  ;;  %795 = vmatpush3.msra.mxu0 %v368_v42 }
  0xb3   :  { %796 = vmatprep.subr.mxu0 %v367_v48  ;;  %v236_v0 = vadd.f32 %v220_v62, %v136_v53  ;;  %v135_v4 = vmul.f32 %v1163_v8, %v82_v49 }
  0xb4   :  { %797 = vmatpush3.msra.mxu0 %v367_v48  ;;  %v214_v48 = vmul.f32 %v1159_v5, %v1151_v1  ;;  %v373_v1 = vld [vmem:[%s1289_s3 + $0x8] sm:$0xff] }
  0xb5   :  { %v313_v52 = vpop.permute.xlu1 %312 }
  0xb6   :  { %v350_v55 = vadd.f32 %v313_v52, %v238_v51  ;;  %v308_v50 = vpop.permute.xlu0 %307 }
  0xb7   :  { %v349_v57 = vadd.f32 %v308_v50, %v237_v54 }
  0xb8   :  { %v366_v58 = vmax.f32 %v350_v55, 0.0 }
  0xb9   :  { %v365_v59 = vmax.f32 %v349_v57, 0.0 }
  0xba   :  { %v174_v61 = vpop.permute.xlu1 %173  ;;  %798 = vmatprep.subr.mxu0 %v366_v58  ;;  %v67_v11 = vpop.permute.xlu0 %66 }
  0xbb   :  { %799 = vmatpush3.msra.mxu0 %v366_v58  ;;  %v219_v7 = vmul.f32 %v1159_v5, %v174_v61  ;;  %v132_v32 = vmul.f32 %v1163_v8, %v67_v11  ;;  %v383_v11 = vld [vmem:[%s1289_s3 + $0x58] sm:$0xff] }
  0xbc   :  { %800 = vmatprep.subr.mxu0 %v365_v59 }
  0xbd   :  { %801 = vmatpush3.msra.mxu0 %v365_v59  ;;  %v235_v12 = vadd.f32 %v219_v7, %v135_v4  ;;  %v379_v4 = vld [vmem:[%s1289_s3 + $0x38] sm:$0xff]  ;;  %v380_v7 = vld [vmem:[%s1289_s3 + $0x40] sm:$0xff] }
  0xbe   :  { %v62_v17 = vpop.permute.xlu0 %61 }
  0xbf   :  { %v77_v63 = vpop.permute.xlu1 %76  ;;  %v131_v38 = vmul.f32 %v1163_v8, %v62_v17 }
  0xc0   :  { %v134_v19 = vmul.f32 %v1163_v8, %v77_v63 }
  0xc2   :  { %v234_v23 = vadd.f32 %v218_v21, %v134_v19  ;;  %v288_v24 = vpop.permute.xlu0 %287 }
  0xc3   :  { %v303_v2 = vpop.permute.xlu1 %302 }
  0xc4   :  { %v348_v3 = vadd.f32 %v303_v2, %v236_v0  ;;  %v376_v0 = vld [vmem:[%s1289_s3 + $0x20] sm:$0xff]  ;;  %v377_v2 = vld [vmem:[%s1289_s3 + $0x28] sm:$0xff] }
  0xc6   :  { %v364_v9 = vmax.f32 %v348_v3, 0.0  ;;  %v47_v44 = vpop.permute.xlu0 %46  ;;  %v378_v3 = vld [vmem:[%s1289_s3 + $0x30] sm:$0xff] }
  0xc7   :  { %v72_v10 = vpop.permute.xlu1 %71  ;;  %v128_v50 = vmul.f32 %v1163_v8, %v47_v44 }
  0xc8   :  { %802 = vmatprep.subr.mxu0 %v364_v9  ;;  %v133_v15 = vmul.f32 %v1163_v8, %v72_v10  ;;  %v382_v10 = vld [vmem:[%s1289_s3 + $0x50] sm:$0xff] }
  0xc9   :  { %803 = vmatpush3.msra.mxu0 %v364_v9  ;;  %v381_v9 = vld [vmem:[%s1289_s3 + $0x48] sm:$0xff] }
  0xca   :  { %v233_v22 = vadd.f32 %v217_v18, %v133_v15  ;;  %v268_v54 = vpop.permute.xlu0 %267  ;;  %v387_v15 = vld [vmem:[%s1289_s3 + $0x78] sm:$0xff] }
  0xcb   :  { %v298_v13 = vpop.permute.xlu1 %297 }
  0xcc   :  { %v347_v14 = vadd.f32 %v298_v13, %v235_v12  ;;  %v345_v27 = vadd.f32 %v288_v24, %v233_v22  ;;  %v384_v12 = vld [vmem:[%s1289_s3 + $0x60] sm:$0xff]  ;;  %v385_v13 = vld [vmem:[%s1289_s3 + $0x68] sm:$0xff] }
  0xce   :  { %v363_v16 = vmax.f32 %v347_v14, 0.0  ;;  %v361_v30 = vmax.f32 %v345_v27, 0.0  ;;  %v386_v14 = vld [vmem:[%s1289_s3 + $0x70] sm:$0xff] }
  0xd0   :  { %v162_v20 = vpop.permute.xlu1 %161  ;;  %804 = vmatprep.subr.mxu0 %v363_v16 }
  0xd1   :  { %805 = vmatpush3.msra.mxu0 %v363_v16  ;;  %v216_v60 = vmul.f32 %v1159_v5, %v162_v20  ;;  %v929_v16 = vmov 0.0  }
  0xd2   :  { %844 = vmatprep.subr.mxu1 %v929_v16  ;;  %876 = vmatprep.mubr.msk.f32.mxu1 %vm930_vm0, %v929_v16 }
  0xd3   :  { %v232_v33 = vadd.f32 %v216_v60, %v132_v32 }
  0xd5   :  { %v293_v25 = vpop.permute.xlu1 %292 }
  0xd6   :  { %v346_v26 = vadd.f32 %v293_v25, %v234_v23  ;;  %v482_v23 = vpop.permute.xlu0 %481 }
  0xd8   :  { %v362_v28 = vmax.f32 %v346_v26, 0.0 }
  0xda   :  { %v158_v29 = vpop.permute.xlu1 %157  ;;  %806 = vmatprep.subr.mxu0 %v362_v28 }
  0xdb   :  { %807 = vmatpush3.msra.mxu0 %v362_v28  ;;  %v215_v35 = vmul.f32 %v1159_v5, %v158_v29  ;;  %v472_v28 = vpop.permute.xlu0 %471 }
  0xdc   :  { %808 = vmatprep.subr.mxu0 %v361_v30 }
  0xdd   :  { %809 = vmatpush3.msra.mxu0 %v361_v30  ;;  %v231_v39 = vadd.f32 %v215_v35, %v131_v38 }
  0xdf   :  { %v57_v31 = vpop.permute.xlu1 %56  ;;  %v462_v32 = vpop.permute.xlu0 %461 }
  0xe0   :  { %v130_v46 = vmul.f32 %v1163_v8, %v57_v31 }
  0xe2   :  { %v230_v52 = vadd.f32 %v214_v48, %v130_v46 }
  0xe3   :  { %v283_v56 = vpop.permute.xlu1 %282 }
  0xe4   :  { %v344_v34 = vadd.f32 %v283_v56, %v232_v33 }
  0xe6   :  { %v360_v36 = vmax.f32 %v344_v34, 0.0 }
  0xe7   :  { %v52_v37 = vpop.permute.xlu1 %51 }
  0xe8   :  { %810 = vmatprep.subr.mxu0 %v360_v36  ;;  %v129_v42 = vmul.f32 %v1163_v8, %v52_v37  ;;  %v375_v8 = vld [vmem:[%s1289_s3 + $0x18] sm:$0xff]  ;;  %v452_v37 = vpop.permute.xlu0 %451 }
  0xe9   :  { %811 = vmatpush3.msra.mxu0 %v360_v36 }
  0xea   :  { %v229_v49 = vadd.f32 %v213_v45, %v129_v42 }
  0xeb   :  { %v278_v40 = vpop.permute.xlu1 %277 }
  0xec   :  { %v343_v41 = vadd.f32 %v278_v40, %v231_v39  ;;  %v341_v58 = vadd.f32 %v268_v54, %v229_v49 }
  0xee   :  { %v359_v43 = vmax.f32 %v343_v41, 0.0  ;;  %v357_v62 = vmax.f32 %v341_v58, 0.0 }
  0xf0   :  { %v146_v47 = vpop.permute.xlu1 %145  ;;  %812 = vmatprep.subr.mxu0 %v359_v43 }
  0xf1   :  { %813 = vmatpush3.msra.mxu0 %v359_v43  ;;  %v212_v51 = vmul.f32 %v1159_v5, %v146_v47  ;;  %v374_v5 = vld [vmem:[%s1289_s3 + $0x10] sm:$0xff]  ;;  %v442_v47 = vpop.permute.xlu0 %441 }
  0xf3   :  { %v228_v6 = vadd.f32 %v212_v51, %v128_v50 }
  0xf5   :  { %v273_v55 = vpop.permute.xlu1 %272 }
  0xf6   :  { %v342_v57 = vadd.f32 %v273_v55, %v230_v52 }
  0xf8   :  { %v358_v59 = vmax.f32 %v342_v57, 0.0  ;;  %v432_v57 = vpop.permute.xlu0 %431 }
  0xf9   :  { %v263_v61 = vpop.permute.xlu1 %262 }
  0xfa   :  { %v340_v53 = vadd.f32 %v263_v61, %v228_v6  ;;  %814 = vmatprep.subr.mxu0 %v358_v59 }
  0xfb   :  { %815 = vmatpush3.msra.mxu0 %v358_v59 }
  0xfc   :  { %v356_v63 = vmax.f32 %v340_v53, 0.0  ;;  %816 = vmatprep.subr.mxu0 %v357_v62 }
  0xfd   :  { %817 = vmatpush3.msra.mxu0 %v357_v62  ;;  %v477_v25 = vpop.permute.xlu1 %476 }
  0xfe   :  { %818 = vmatprep.subr.mxu0 %v356_v63 }
  0xff   :  { %819 = vmatpush3.msra.mxu0 %v356_v63 }
 0x100   :  { %821 = vmatmul.mubr.f32.vlgmr.msra.gmra.mxu0 %v373_v1  ;;  %v422_v1 = vpop.permute.xlu0 %421 }
 0x101   :  { %823 = vmatprep.mubr.f32.mxu0 %v374_v5  ;;  %v467_v30 = vpop.permute.xlu1 %466 }
 0x104   :  { %824 = vmatmul.mubr.f32.gmra.mxu0 %v375_v8 }
 0x105   :  { %826 = vmatprep.mubr.f32.mxu0 %v376_v0  ;;  %v457_v56 = vpop.permute.xlu1 %456 }
 0x108   :  { %827 = vmatmul.mubr.f32.gmra.mxu0 %v377_v2 }
 0x109   :  { %829 = vmatprep.mubr.f32.mxu0 %v378_v3  ;;  %v447_v42 = vpop.permute.xlu1 %446 }
 0x10c   :  { %830 = vmatmul.mubr.f32.gmra.mxu0 %v379_v4 }
 0x10d   :  { %832 = vmatprep.mubr.f32.mxu0 %v380_v7  ;;  %v437_v51 = vpop.permute.xlu1 %436 }
 0x110   :  { %833 = vmatmul.mubr.f32.gmra.mxu0 %v381_v9  ;;  %v412_v9 = vpop.permute.xlu0 %411 }
 0x111   :  { %835 = vmatprep.mubr.f32.mxu0 %v382_v10  ;;  %v427_v6 = vpop.permute.xlu1 %426 }
 0x114   :  { %836 = vmatmul.mubr.f32.gmra.mxu0 %v383_v11 }
 0x115   :  { %838 = vmatprep.mubr.f32.mxu0 %v384_v12  ;;  %v417_v0 = vpop.permute.xlu1 %416 }
 0x118   :  { %839 = vmatmul.mubr.f32.gmra.mxu0 %v385_v13 }
 0x119   :  { %841 = vmatprep.mubr.f32.mxu0 %v386_v14  ;;  %v407_v12 = vpop.permute.xlu1 %406 }
 0x11c   :  { %842 = vmatmul.mubr.f32.gmra.mxu0 %v387_v15 }
 0x1c0   :  { %v1253_v17 = vpop.f32.mrf.mxu0 }
 0x1c1   :  { %v556_v10 = vadd.f32 %v1253_v17, %v412_v9  ;;  %v645_v17 = vld [vmem:[%s1291_s5] sm:$0x7] }
 0x1c2   :  { %v1255_v18 = vpop.f32.mrf.mxu0 }
 0x1c3   :  { %v551_v13 = vadd.f32 %v1255_v18, %v407_v12  ;;  %v630_v15 = vmax.f32 %v556_v10, 0.0 }
 0x1c4   :  { %v1257_v19 = vpop.f32.mrf.mxu0 }
 0x1c5   :  { %v566_v2 = vadd.f32 %v1257_v19, %v422_v1  ;;  %v629_v19 = vmax.f32 %v551_v13, 0.0 }
 0x1c6   :  { %v1259_v20 = vpop.f32.mrf.mxu0 }
 0x1c7   :  { %v561_v4 = vadd.f32 %v1259_v20, %v417_v0  ;;  %v632_v11 = vmax.f32 %v566_v2, 0.0  ;;  %v650_v20 = vpop.permute.xlu0 %649 }
 0x1c8   :  { %v828_v21 = vpop.f32.mrf.mxu0 }
 0x1c9   :  { %v576_v62 = vadd.f32 %v828_v21, %v432_v57  ;;  %v631_v14 = vmax.f32 %v561_v4, 0.0 }
 0x1ca   :  { %v570_v22 = vpop.f32.mrf.mxu0 }
 0x1cb   :  { %v571_v5 = vadd.f32 %v570_v22, %v427_v6  ;;  %v634_v3 = vmax.f32 %v576_v62, 0.0 }
 0x1cc   :  { %v831_v24 = vpop.f32.mrf.mxu0 }
 0x1cd   :  { %v586_v58 = vadd.f32 %v831_v24, %v442_v47  ;;  %v633_v7 = vmax.f32 %v571_v5, 0.0 }
 0x1ce   :  { %v580_v26 = vpop.f32.mrf.mxu0 }
 0x1cf   :  { %v581_v61 = vadd.f32 %v580_v26, %v437_v51  ;;  %v636_v63 = vmax.f32 %v586_v58, 0.0 }
 0x1d0   :  { %v834_v27 = vpop.f32.mrf.mxu0 }
 0x1d1   :  { %v596_v52 = vadd.f32 %v834_v27, %v452_v37  ;;  %v635_v8 = vmax.f32 %v581_v61, 0.0 }
 0x1d2   :  { %v590_v29 = vpop.f32.mrf.mxu0 }
 0x1d3   :  { %v591_v55 = vadd.f32 %v590_v29, %v447_v42  ;;  %v638_v59 = vmax.f32 %v596_v52, 0.0 }
 0x1d4   :  { %v837_v60 = vpop.f32.mrf.mxu0 }
 0x1d5   :  { %v606_v45 = vadd.f32 %v837_v60, %v462_v32  ;;  %v637_v53 = vmax.f32 %v591_v55, 0.0 }
 0x1d6   :  { %v600_v31 = vpop.f32.mrf.mxu0 }
 0x1d7   :  { %v601_v48 = vadd.f32 %v600_v31, %v457_v56  ;;  %v640_v54 = vmax.f32 %v606_v45, 0.0 }
 0x1d8   :  { %v840_v33 = vpop.f32.mrf.mxu0 }
 0x1d9   :  { %v616_v39 = vadd.f32 %v840_v33, %v472_v28  ;;  %v639_v50 = vmax.f32 %v601_v48, 0.0 }
 0x1da   :  { %v610_v34 = vpop.f32.mrf.mxu0 }
 0x1db   :  { %v611_v43 = vadd.f32 %v610_v34, %v467_v30  ;;  %v642_v46 = vmax.f32 %v616_v39, 0.0 }
 0x1dc   :  { %v843_v35 = vpop.f32.mrf.mxu0 }
 0x1dd   :  { %v626_v36 = vadd.f32 %v843_v35, %v482_v23  ;;  %v641_v49 = vmax.f32 %v611_v43, 0.0 }
 0x1de   :  { %v620_v38 = vpop.f32.mrf.mxu0 }
 0x1df   :  { %v644_v40 = vmax.f32 %v626_v36, 0.0  ;;  %v621_v41 = vadd.f32 %v620_v38, %v477_v25 }
 0x1e1   :  { %v643_v44 = vmax.f32 %v621_v41, 0.0  ;;  %845 = vmatpush3.msra.mxu1 %v644_v40 }
 0x1e2   :  { %846 = vmatprep.subr.mxu1 %v929_v16 }
 0x1e3   :  { %847 = vmatpush3.msra.mxu1 %v643_v44 }
 0x1e4   :  { %848 = vmatprep.subr.mxu1 %v929_v16 }
 0x1e5   :  { %849 = vmatpush3.msra.mxu1 %v642_v46 }
 0x1e6   :  { %850 = vmatprep.subr.mxu1 %v929_v16 }
 0x1e7   :  { %851 = vmatpush3.msra.mxu1 %v641_v49 }
 0x1e8   :  { %852 = vmatprep.subr.mxu1 %v929_v16 }
 0x1e9   :  { %853 = vmatpush3.msra.mxu1 %v640_v54 }
 0x1ea   :  { %854 = vmatprep.subr.mxu1 %v929_v16 }
 0x1eb   :  { %855 = vmatpush3.msra.mxu1 %v639_v50 }
 0x1ec   :  { %856 = vmatprep.subr.mxu1 %v929_v16 }
 0x1ed   :  { %857 = vmatpush3.msra.mxu1 %v638_v59 }
 0x1ee   :  { %858 = vmatprep.subr.mxu1 %v929_v16 }
 0x1ef   :  { %859 = vmatpush3.msra.mxu1 %v637_v53 }
 0x1f0   :  { %860 = vmatprep.subr.mxu1 %v929_v16 }
 0x1f1   :  { %861 = vmatpush3.msra.mxu1 %v636_v63 }
 0x1f2   :  { %862 = vmatprep.subr.mxu1 %v929_v16 }
 0x1f3   :  { %863 = vmatpush3.msra.mxu1 %v635_v8 }
 0x1f4   :  { %864 = vmatprep.subr.mxu1 %v929_v16 }
 0x1f5   :  { %865 = vmatpush3.msra.mxu1 %v634_v3 }
 0x1f6   :  { %866 = vmatprep.subr.mxu1 %v929_v16 }
 0x1f7   :  { %867 = vmatpush3.msra.mxu1 %v633_v7 }
 0x1f8   :  { %868 = vmatprep.subr.mxu1 %v929_v16 }
 0x1f9   :  { %869 = vmatpush3.msra.mxu1 %v632_v11 }
 0x1fa   :  { %870 = vmatprep.subr.mxu1 %v929_v16 }
 0x1fb   :  { %871 = vmatpush3.msra.mxu1 %v631_v14 }
 0x1fc   :  { %872 = vmatprep.subr.mxu1 %v929_v16 }
 0x1fd   :  { %873 = vmatpush3.msra.mxu1 %v630_v15 }
 0x1fe   :  { %874 = vmatprep.subr.mxu1 %v929_v16 }
 0x1ff   :  { %875 = vmatpush3.msra.mxu1 %v629_v19 }
 0x200   :  { %877 = vmatmul.mubr.f32.vlgmr.msra.gmra.mxu1 %v645_v17 }
 0x2c0   :  { %v718_v18 = vpop.f32.mrf.mxu1 }
 0x2c1   :  { %v719_v21 = vadd.f32 %v718_v18, %v650_v20 }
 0x2c2   :  { %v878_v22 = vpop.f32.mrf.mxu1 }
 0x2c3   :  { %903 = vtanh.f32 %v719_v21 }
 0x2d0   :  { %v904_v23 = vpop.eup %903 }
 0x2d1   :  { %v723_v24 = vmul.f32 5.0, %v904_v23 }
 0x2d3   :  { %724 = vst [vmem:[#allocation2] sm:$0x7] %v723_v24 }
 0x2d4   :  { %916 = shalt.err (!%p913_p4)
}
 0x2d5   :  { %734 = dma.vmem_to_hbm [thread:$0]  %s732_s9, 64, %s1293_s7, [#allocation3]  }
 0x2d6   :  { %925 = dma.done.wait [#allocation3], 64  }
 0x2d7   :  { %926 = vsyncadd [#allocation3], 4294967232 }
 0x2d8   :  { %738 = vsyncpa [#allocation3], 1 }

</bundles_post_ra>
